<compile_context>
chip_gen: v5e
topology: v5e:2x2
jax: 0.10.0
libtpu: 0.0.40
codegen_flags: <defaults>
</compile_context>

<pallas_src>
import functools

import jax
import jax.numpy as jnp
from jax.experimental import pallas as pl
from jax.experimental.pallas import tpu as pltpu


LANES = 128
# 4096 x 128 f32 = 2 MiB per input block; 2 inputs x 2 pipeline buffers = 8 MiB,
# comfortably inside the scoped-VMEM default on v5e/v6e/v7x.
MAX_BLOCK_ROWS = 4096


def _charbonnier_partial_kernel(x_ref, y_ref, psum_ref, *, eps2):
    # Upcast in-vreg; inputs stay in their HBM dtype (bf16 callers pay half the DMA bytes).
    d = x_ref[...].astype(jnp.float32) - y_ref[...].astype(jnp.float32)
    val = jnp.sqrt(d * d + jnp.float32(eps2))
    # Per-block sublane reduction -> one lane-dense (1, 128) partial-sum row.
    psum_ref[...] = jnp.sum(val, axis=0, keepdims=True)


def charbonnier_loss(x, y, eps=1e-3):
    assert x.shape == y.shape
    n = int(x.size)
    eps = float(eps)

    xf = x.reshape(-1)
    yf = y.reshape(-1)

    # Lay the data out as a lane-dense (rows, 128) slab.
    rows = pl.cdiv(n, LANES)
    block_rows = min(rows, MAX_BLOCK_ROWS)
    rows_padded = pl.cdiv(rows, block_rows) * block_rows
    n_pad = rows_padded * LANES
    pad = n_pad - n
    if pad:
        # TODO(synk): for huge inputs, mask only the ragged last block instead
        # of materializing a padded copy; negligible for typical sizes.
        xf = jnp.pad(xf, (0, pad))
        yf = jnp.pad(yf, (0, pad))
    x2d = xf.reshape(rows_padded, LANES)
    y2d = yf.reshape(rows_padded, LANES)

    num_blocks = rows_padded // block_rows
    kernel = functools.partial(_charbonnier_partial_kernel, eps2=eps * eps)

    partials = pl.pallas_call(
        kernel,
        out_shape=jax.ShapeDtypeStruct((num_blocks, LANES), jnp.float32),
        grid_spec=pl.GridSpec(
            grid=(num_blocks,),
            in_specs=[
                pl.BlockSpec((block_rows, LANES), lambda i: (i, 0)),
                pl.BlockSpec((block_rows, LANES), lambda i: (i, 0)),
            ],
            out_specs=pl.BlockSpec((1, LANES), lambda i: (i, 0)),
        ),
        compiler_params=pltpu.CompilerParams(
            # Independent per-block partial sums -> parallel (shards across the
            # two TensorCores on v7x; no-op on single-TC v5e/v6e).
            dimension_semantics=("parallel",),
        ),
    )(x2d, y2d)

    # Zero padding contributes exactly sqrt(0 + eps^2) == eps per padded element:
    # correct analytically instead of masking every element in the kernel.
    total = jnp.sum(partials) - jnp.float32(pad) * jnp.float32(eps)
    return total / jnp.float32(n)


def charbonnier_loss_ref(x, y, eps=1e-3):
    d = x.astype(jnp.float32) - y.astype(jnp.float32)
    return jnp.mean(jnp.sqrt(d * d + eps * eps))


if __name__ == "__main__":
    key = jax.random.PRNGKey(0)
    kx, ky = jax.random.split(key)
    # NCHW inputs, as the PyTorch module would receive.
    x = jax.random.normal(kx, (2, 4, 16, 16), dtype=jnp.float32)
    y = jax.random.normal(ky, (2, 4, 16, 16), dtype=jnp.float32)

    loss = charbonnier_loss(x, y)
    loss = jax.block_until_ready(loss)

    ref = charbonnier_loss_ref(x, y)
    assert jnp.allclose(loss, ref, rtol=1e-5, atol=1e-6), (loss, ref)

    print("KERNEL_OK")
</pallas_src>

<mosaic_0001>
module attributes {stable_mosaic.version = 11 : i64} {
  func.func @_charbonnier_partial_kernel(%arg0: i32, %arg1: memref<16x128xf32, #tpu.memory_space<vmem>>, %arg2: memref<16x128xf32, #tpu.memory_space<vmem>>, %arg3: memref<1x128xf32, #tpu.memory_space<vmem>>) attributes {dimension_semantics = [#tpu.dimension_semantics<parallel>], iteration_bounds = array<i64: 1>, scalar_prefetch = 0 : i64, scratch_operands = 0 : i64, tpu.core_type = #tpu.core_type<tc>, window_params = [{transform_indices = @transform_0, window_bounds = array<i64: 16, 128>}, {transform_indices = @transform_1, window_bounds = array<i64: 16, 128>}, {transform_indices = @transform_2, window_bounds = array<i64: 1, 128>}]} {
    %c0 = arith.constant 0 : index
    %c0_0 = arith.constant 0 : index
    %0 = vector.load %arg1[%c0, %c0_0] : memref<16x128xf32, #tpu.memory_space<vmem>>, vector<16x128xf32>
    %c0_1 = arith.constant 0 : index
    %c0_2 = arith.constant 0 : index
    %1 = vector.load %arg2[%c0_1, %c0_2] : memref<16x128xf32, #tpu.memory_space<vmem>>, vector<16x128xf32>
    %2 = arith.subf %0, %1 : vector<16x128xf32>
    %3 = arith.mulf %2, %2 : vector<16x128xf32>
    %cst = arith.constant 9.99999997E-7 : f32
    %4 = vector.broadcast %cst : f32 to vector<16x128xf32>
    %5 = arith.addf %3, %4 : vector<16x128xf32>
    %6 = math.sqrt %5 : vector<16x128xf32>
    %cst_3 = arith.constant dense<0.000000e+00> : vector<128xf32>
    %7 = vector.multi_reduction <add>, %6, %cst_3 [0] : vector<16x128xf32> to vector<128xf32>
    %8 = vector.shape_cast %7 : vector<128xf32> to vector<1x128xf32>
    %c0_4 = arith.constant 0 : index
    %c0_5 = arith.constant 0 : index
    %9 = vector.load %arg3[%c0_4, %c0_5] : memref<1x128xf32, #tpu.memory_space<vmem>>, vector<1x128xf32>
    tpu.vector_store %arg3[%c0_4, %c0_5], %8 {strides = array<i32>} : memref<1x128xf32, #tpu.memory_space<vmem>>, vector<1x128xf32>,
    return
  }
  func.func @transform_0(%arg0: i32) -> (i32, i32) {
    %c0_i32 = arith.constant 0 : i32
    %c0_i32_0 = arith.constant 0 : i32
    return %arg0, %c0_i32 : i32, i32
  }
  func.func @transform_1(%arg0: i32) -> (i32, i32) {
    %c0_i32 = arith.constant 0 : i32
    %c0_i32_0 = arith.constant 0 : i32
    return %arg0, %c0_i32 : i32, i32
  }
  func.func @transform_2(%arg0: i32) -> (i32, i32) {
    %c0_i32 = arith.constant 0 : i32
    %c0_i32_0 = arith.constant 0 : i32
    return %arg0, %c0_i32 : i32, i32
  }
}

</mosaic_0001>

<bundles_post_ra>
// kernel: tpu_custom_call.1
= control target key start
LH: loop header
LB: loop body
LE: loop exit
PB: predicated region body
PF: predicated region fallthrough
CT: control target
= control target key end

     0   :  { %7 = vsyncpa [#allocation3], 0  ;;  %s220_s0 = inlined_call_operand.hbm [shape: f32[16,128], index: 0, kind: input, shape index: {}]   ;;  %s221_s1 = inlined_call_operand.hbm [shape: f32[16,128], index: 1, kind: input, shape index: {}]   ;;  %s222_s2 = inlined_call_operand.hbm [shape: f32[1,128], index: 2, kind: output, shape index: {}]  }
   0x1   :  { %8 = vsyncpa [#allocation6], 0 }
   0x2   :  { %9 = vsyncpa [#allocation4], 0  ;;  %s14_s11 = sshll.u32 %s220_s0, 4  ;;  %s191_s12 = smov [#allocation2]   ;;  %s15_s11 = int_to_ptr.hbm [resolvable:$true] %s14_s11 }
   0x3   :  { %s16_s13 = sshll.u32 %s191_s12, 4  ;;  %s27_s16 = sshll.u32 %s221_s1, 4  ;;  %s17_s13 = int_to_ptr.vmem [resolvable:$true] %s16_s13  ;;  %s28_s16 = int_to_ptr.hbm [resolvable:$true] %s27_s16 }
   0x4   :  { %s192_s17 = smov 128   ;;  %s193_s18 = smov 8  }
   0x5   :  { %22 = dma.hbm_to_vmem [thread:$0]  %s15_s11, 256, %s17_s13, [#allocation3], %s192_s17, %s192_s17, %s193_s18  }
   0x6   :  { %s194_s19 = smov [#allocation5]  }
   0x7   :  { %s29_s20 = sshll.u32 %s194_s19, 4  ;;  %s30_s20 = int_to_ptr.vmem [resolvable:$true] %s29_s20 }
   0x8   :  { %35 = dma.hbm_to_vmem [thread:$0]  %s28_s16, 256, %s30_s20, [#allocation6], %s192_s17, %s192_s17, %s193_s18  }
   0x9   :  { %185 = dma.done.wait [#allocation3], 256  }
   0xa   :  { %186 = vsyncadd [#allocation3], 4294967040 }
   0xb   :  { %187 = dma.done.wait [#allocation6], 256  }
   0xc   :  { %188 = vsyncadd [#allocation6], 4294967040  ;;  %v44_v0 = vld [vmem:[#allocation2] sm:$0xff]  ;;  %v45_v1 = vld [vmem:[#allocation2 + $0x8] sm:$0xff]  ;;  %s195_s0 = smov [#allocation7]   ;;  %s93_s23 = sshll.u32 %s222_s2, 4  ;;  %s94_s23 = int_to_ptr.hbm [resolvable:$true] %s93_s23 }
   0xd   :  { %v46_v2 = vld [vmem:[#allocation5] sm:$0xff]  ;;  %v47_v3 = vld [vmem:[#allocation5 + $0x8] sm:$0xff]  ;;  %s91_s1 = sshll.u32 %s195_s0, 4  ;;  %s92_s1 = int_to_ptr.vmem [resolvable:$true] %s91_s1 }
   0xe   :  { %v48_v4 = vsub.f32 %v44_v0, %v46_v2  ;;  %v49_v5 = vsub.f32 %v45_v1, %v47_v3 }
  0x10   :  { %v50_v6 = vmul.f32 %v48_v4, %v48_v4  ;;  %v51_v7 = vmul.f32 %v49_v5, %v49_v5 }
  0x12   :  { %v52_v8 = vadd.f32 1e-06, %v50_v6  ;;  %v53_v9 = vadd.f32 1e-06, %v51_v7 }
  0x14   :  { %109 = vrsqrt.f32 %v52_v8  ;;  %vm61_vm0 = vcmp.eq.f32.partialorder %v52_v8, inf  ;;  %v64_v21 = vand.u32 2147483648, %v52_v8  ;;  %vm63_vm1 = vcmp.eq.f32.partialorder %v52_v8, 0.0 }
  0x15   :  { %111 = vrsqrt.f32 %v53_v9  ;;  %vm73_vm2 = vcmp.eq.f32.partialorder %v53_v9, inf  ;;  %v76_v24 = vand.u32 2147483648, %v53_v9  ;;  %vm75_vm3 = vcmp.eq.f32.partialorder %v53_v9, 0.0 }
  0x1a   :  { %v110_v10 = vpop.eup %109 }
  0x1b   :  { %v112_v11 = vpop.eup %111  ;;  %v55_v12 = vmul.f32 %v110_v10, %v52_v8 }
  0x1c   :  { %v67_v13 = vmul.f32 %v112_v11, %v53_v9 }
  0x1d   :  { %v56_v14 = vmul.f32 %v110_v10, %v55_v12 }
  0x1e   :  { %v68_v15 = vmul.f32 %v112_v11, %v67_v13 }
  0x1f   :  { %v57_v16 = vmul.f32 0.5, %v56_v14 }
  0x20   :  { %v69_v17 = vmul.f32 0.5, %v68_v15 }
  0x21   :  { %v58_v18 = vsub.f32 1.5, %v57_v16 }
  0x22   :  { %v70_v19 = vsub.f32 1.5, %v69_v17 }
  0x23   :  { %v59_v20 = vmul.f32 %v110_v10, %v58_v18 }
  0x24   :  { %v71_v22 = vmul.f32 %v112_v11, %v70_v19 }
  0x25   :  { %v60_v23 = vmul.f32 %v59_v20, %v52_v8 }
  0x26   :  { %v72_v25 = vmul.f32 %v71_v22, %v53_v9 }
  0x27   :  { %v62_v26 = vsel %vm61_vm0, %v52_v8, %v60_v23 }
  0x28   :  { %v65_v27 = vsel %vm63_vm1, %v64_v21, %v62_v26  ;;  %v74_v28 = vsel %vm73_vm2, %v53_v9, %v72_v25 }
  0x29   :  { %v77_v29 = vsel %vm75_vm3, %v76_v24, %v74_v28 }
  0x2a   :  { %v78_v30 = vadd.f32 %v77_v29, %v65_v27 }
  0x2c   :  { %v79_v31 = vrot.slane %v78_v30, 4 }
  0x2e   :  { %v80_v32 = vadd.f32 %v79_v31, %v78_v30 }
  0x30   :  { %v81_v33 = vrot.slane %v80_v32, 2 }
  0x32   :  { %v82_v34 = vadd.f32 %v81_v33, %v80_v32 }
  0x34   :  { %v83_v35 = vrot.slane %v82_v34, 1 }
  0x36   :  { %v84_v36 = vadd.f32 %v83_v35, %v82_v34 }
  0x38   :  { %85 = vst [vmem:[#allocation7] sm:$0x1] %v84_v36 }
  0x39   :  { %96 = dma.vmem_to_hbm [thread:$0]  %s92_s1, 16, %s94_s23, [#allocation4]  }
  0x3a   :  { %189 = dma.done.wait [#allocation4], 16  }
  0x3b   :  { %190 = vsyncadd [#allocation4], 4294967280 }
  0x3c   :  { %101 = vsyncpa [#allocation3], 1 }
  0x3d   :  { %102 = vsyncpa [#allocation6], 1 }
  0x3e   :  { %103 = vsyncpa [#allocation4], 1 }

</bundles_post_ra>
